<compile_context>
chip_gen: v5e
topology: v5e:2x2
jax: 0.10.0
libtpu: 0.0.40
codegen_flags: <defaults>
</compile_context>

<pallas_src>
import functools
import math

import numpy as np
import jax
import jax.numpy as jnp
from jax import lax
from jax.experimental import pallas as pl
from jax.experimental.pallas import tpu as pltpu

_EPS_NORM_SQ = 1e-24   # (F.normalize eps = 1e-12)^2, clamp applied to squared norm
_EPS_BN = 1e-5         # nn.BatchNorm1d eps


# ---------------------------------------------------------------------------
# Fused kernel: encoder -> predictor -> similarity losses -> bank losses
# ---------------------------------------------------------------------------
def _graphacl_fused_kernel(data_ref, aug_ref, enc_w_ref, enc_b_ref,
                           w1_ref, b1_ref, g_ref, be_ref, w2_ref, b2_ref,
                           bank_w_ref, o_ref, *,
                           batch, model, temperature, alpha, contrastive_t):
    f32 = jnp.float32
    bf16 = jnp.bfloat16

    def rownorm(x):
        # F.normalize(x, dim=-1): x / max(||x||, eps), via EUP rsqrt.
        ss = jnp.sum(x * x, axis=-1, keepdims=True)
        return x * lax.rsqrt(jnp.maximum(ss, _EPS_NORM_SQ))

    def mm(a, b):
        # bf16 MXU inputs, f32 accumulation.
        return jnp.dot(a.astype(bf16), b.astype(bf16), preferred_element_type=f32)

    # --- stack both views: every Linear runs ONCE on (2B, .) ----------------
    x = jnp.concatenate([data_ref[...], aug_ref[...]], axis=0)        # (2B, F)
    proj = mm(x, enc_w_ref[...]) + enc_b_ref[...]                     # (2B, E)

    # --- predictor: Linear -> BatchNorm1d(train, PER-VIEW stats) -> ReLU -> Linear
    h = mm(proj, w1_ref[...]) + b1_ref[...]                           # (2B, H)

    def bn(hv):
        mean = jnp.mean(hv, axis=0, keepdims=True)
        var = jnp.mean((hv - mean) * (hv - mean), axis=0, keepdims=True)  # biased
        return (hv - mean) * lax.rsqrt(var + _EPS_BN) * g_ref[...] + be_ref[...]

    h = jnp.concatenate([bn(h[:batch]), bn(h[batch:])], axis=0)
    h = jnp.maximum(h, 0.0)                                           # ReLU
    pred = mm(h, w2_ref[...]) + b2_ref[...]                           # (2B, P)

    # Target encoder is a deepcopy of the online encoder (identical weights),
    # so its projections equal the online projections; reuse them.
    # TODO(synk): once the EMA target update runs, target weights diverge and
    # the target projections must be computed from the target weights instead.
    p = rownorm(pred)                                                  # (2B, P)
    t = rownorm(proj)                                                  # (2B, E)
    p1, p2 = p[:batch], p[batch:]
    t1, t2 = t[:batch], t[batch:]

    # --- memory bank: column-normalized ONCE, no transposed copy ------------
    w = bank_w_ref[...]                                                # (E, K)
    col_ss = jnp.sum(w * w, axis=0, keepdims=True)
    d_norm = w * lax.rsqrt(jnp.maximum(col_ss, _EPS_NORM_SQ))          # (E, K)
    d_norm_bf = d_norm.astype(bf16)

    sim1 = jnp.sum(p1 * t2, -1, keepdims=True)                         # (B, 1)
    sim2 = jnp.sum(p2 * t1, -1, keepdims=True)

    if model == "graphacl":            # infoNCE loss
        inv_t = 1.0 / temperature
        # fold 1/T into the (2B, E) operand; one matmul for both views.
        # NOTE: unguarded exp relies on |sim| <= 1 (unit rows); fine for T=0.2.
        logits = jnp.dot((p * inv_t).astype(bf16), d_norm_bf,
                         preferred_element_type=f32)                   # (2B, K)
        neg = jnp.sum(jnp.exp(logits), -1, keepdims=True)              # (2B, 1)
        neg1, neg2 = neg[:batch], neg[batch:]
        # -log(pos/(pos+neg)) == log(pos+neg) - sim/T   (pos = exp(sim/T))
        l1 = jnp.mean(jnp.log(jnp.exp(sim1 * inv_t) + neg1) - sim1 * inv_t)
        l2 = jnp.mean(jnp.log(jnp.exp(sim2 * inv_t) + neg2) - sim2 * inv_t)
    elif model == "graphacl_star":     # BYOL-like loss (raw l_neg, no temperature)
        l_neg = jnp.dot(p.astype(bf16), d_norm_bf,
                        preferred_element_type=f32)                    # (2B, K)
        neg = jnp.mean(l_neg, -1, keepdims=True)
        neg1, neg2 = neg[:batch], neg[batch:]
        l1 = jnp.mean(2.0 * alpha * neg1 - 2.0 * sim1 + 2.0 - 2.0 * alpha)
        l2 = jnp.mean(2.0 * alpha * neg2 - 2.0 * sim2 + 2.0 - 2.0 * alpha)
    else:
        raise ValueError("Invalid model!")
    loss_sim = 0.5 * (l1 + l2)

    # --- contrastive_loss_wo_aug on W.t() and W (bank read only once) -------
    inv_ct = 1.0 / contrastive_t
    # Rows are unit-norm by construction -> pos == exp(1/T) (constant, folded
    # at trace time).  Degenerate all-zero bank rows/cols would hit the eps
    # clamp and deviate slightly from the torch eps path; accepted.
    pos_const = float(math.exp(inv_ct))

    def contrastive_from_gram(gram_scaled):
        # gram_scaled is already divided by T (folded into the matmul lhs).
        rowsum = jnp.sum(jnp.exp(gram_scaled), -1, keepdims=True)
        # off-diag denominator == rowsum - pos; -log(pos/denom) == log(denom) - 1/T
        return jnp.mean(jnp.log(rowsum - pos_const)) - inv_ct

    # rows of W.t() normalized == columns of W normalized == d_norm; gram is
    # d_norm.T @ d_norm computed by contracting dim 0 (no transposed copy).
    gram_so = lax.dot_general((d_norm * inv_ct).astype(bf16), d_norm_bf,
                              (((0,), (0,)), ((), ())),
                              preferred_element_type=f32)              # (K, K)
    loss_so = contrastive_from_gram(gram_so)

    wr = rownorm(w)                                                    # (E, K)
    gram_sd = lax.dot_general((wr * inv_ct).astype(bf16), wr.astype(bf16),
                              (((1,), (1,)), ((), ())),
                              preferred_element_type=f32)              # (E, E)
    loss_sd = contrastive_from_gram(gram_sd)

    # --- pack the three scalars into a single lane-dense (1, 128) store -----
    lanes = lax.broadcasted_iota(jnp.int32, o_ref.shape, 1)
    o_ref[...] = (loss_sim * (lanes == 0).astype(f32)
                  + loss_so * (lanes == 1).astype(f32)
                  + loss_sd * (lanes == 2).astype(f32))


# ---------------------------------------------------------------------------
# Wrapper: one pallas_call for the whole forward
# ---------------------------------------------------------------------------
@functools.partial(jax.jit,
                   static_argnames=("model", "temperature", "alpha", "contrastive_t"))
def graphacl_forward(data, data_aug, params, bank_w, *, model="graphacl",
                     temperature=0.2, alpha=1.0, contrastive_t=0.2):
    # TODO(synk): EMA target-weight update and BatchNorm running-stat updates
    # are stateful training bookkeeping outside this forward value and are not
    # produced here.
    batch = data.shape[0]
    kernel = functools.partial(
        _graphacl_fused_kernel, batch=batch, model=model,
        temperature=float(temperature), alpha=float(alpha),
        contrastive_t=float(contrastive_t))
    vmem = lambda: pl.BlockSpec(memory_space=pltpu.MemorySpace.VMEM)
    out = pl.pallas_call(
        kernel,
        out_shape=jax.ShapeDtypeStruct((1, 128), jnp.float32),
        in_specs=[vmem() for _ in range(11)],
        out_specs=vmem(),
        compiler_params=pltpu.CompilerParams(vmem_limit_bytes=32 << 20),
    )(data, data_aug,
      params["enc_w"], params["enc_b"].reshape(1, -1),
      params["p_w1"], params["p_b1"].reshape(1, -1),
      params["p_gamma"].reshape(1, -1), params["p_beta"].reshape(1, -1),
      params["p_w2"], params["p_b2"].reshape(1, -1),
      bank_w)
    return out[0, 0], out[0, 1], out[0, 2]


# ---------------------------------------------------------------------------
# Deterministic parameter / input construction and run
# ---------------------------------------------------------------------------
if __name__ == "__main__":
    B = 8                      # batch of graphs
    FEAT_DIM = 16              # input graph feature dim
    EMB_DIM = 32               # encoder output / emb_dim
    PROJ_HIDDEN = 16           # projection_hidden_size
    PRED_SIZE = 32             # prediction_size (== emb_dim so dot products work)
    BANK_K = 64                # memory bank size (NOT zero-padded: padded zero
                               # columns would add exp(0)=1 terms to neg sums)
    TEMPERATURE = 0.2          # args.bank_t

    key = jax.random.PRNGKey(0)
    keys = jax.random.split(key, 12)

    # encoder `net`: a simple Linear(feat_dim, emb_dim) stand-in
    params = {
        "enc_w": 0.1 * jax.random.normal(keys[0], (FEAT_DIM, EMB_DIM), jnp.float32),
        "enc_b": 0.1 * jax.random.normal(keys[1], (EMB_DIM,), jnp.float32),
        # online_predictor: Linear(emb,hidden) -> BN1d(hidden) -> ReLU -> Linear(hidden,pred)
        "p_w1": 0.1 * jax.random.normal(keys[2], (EMB_DIM, PROJ_HIDDEN), jnp.float32),
        "p_b1": 0.1 * jax.random.normal(keys[3], (PROJ_HIDDEN,), jnp.float32),
        "p_gamma": jnp.ones((PROJ_HIDDEN,), jnp.float32),
        "p_beta": jnp.zeros((PROJ_HIDDEN,), jnp.float32),
        "p_w2": 0.1 * jax.random.normal(keys[4], (PROJ_HIDDEN, PRED_SIZE), jnp.float32),
        "p_b2": 0.1 * jax.random.normal(keys[5], (PRED_SIZE,), jnp.float32),
    }

    # memory bank weights W: (emb_dim, bank_size)
    bank_w = jax.random.normal(keys[6], (EMB_DIM, BANK_K), jnp.float32)

    # inputs (pooled graph features for `data` and its augmentation)
    data = jax.random.normal(keys[7], (B, FEAT_DIM), jnp.float32)
    data_aug = data + 0.05 * jax.random.normal(keys[8], (B, FEAT_DIM), jnp.float32)

    loss_sim, loss_so, loss_sd = graphacl_forward(
        data, data_aug, params, bank_w,
        model="graphacl", temperature=TEMPERATURE, alpha=1.0)

    jax.block_until_ready((loss_sim, loss_so, loss_sd))
    loss_list = np.array([float(loss_sim), float(loss_so), float(loss_sd)])
    assert np.all(np.isfinite(loss_list))
    print("KERNEL_OK")
</pallas_src>

<mosaic_0001>
module attributes {stable_mosaic.version = 11 : i64} {
  func.func @_graphacl_fused_kernel(%arg0: memref<8x16xf32, #tpu.memory_space<vmem>>, %arg1: memref<8x16xf32, #tpu.memory_space<vmem>>, %arg2: memref<16x32xf32, #tpu.memory_space<vmem>>, %arg3: memref<1x32xf32, #tpu.memory_space<vmem>>, %arg4: memref<32x16xf32, #tpu.memory_space<vmem>>, %arg5: memref<1x16xf32, #tpu.memory_space<vmem>>, %arg6: memref<1x16xf32, #tpu.memory_space<vmem>>, %arg7: memref<1x16xf32, #tpu.memory_space<vmem>>, %arg8: memref<16x32xf32, #tpu.memory_space<vmem>>, %arg9: memref<1x32xf32, #tpu.memory_space<vmem>>, %arg10: memref<32x64xf32, #tpu.memory_space<vmem>>, %arg11: memref<1x128xf32, #tpu.memory_space<vmem>>) attributes {dimension_semantics = [], scalar_prefetch = 0 : i64, scratch_operands = 0 : i64, tpu.core_type = #tpu.core_type<tc>} {
    %c0 = arith.constant 0 : index
    %c0_0 = arith.constant 0 : index
    %0 = vector.load %arg0[%c0, %c0_0] : memref<8x16xf32, #tpu.memory_space<vmem>>, vector<8x16xf32>
    %c0_1 = arith.constant 0 : index
    %c0_2 = arith.constant 0 : index
    %1 = vector.load %arg1[%c0_1, %c0_2] : memref<8x16xf32, #tpu.memory_space<vmem>>, vector<8x16xf32>
    %2 = tpu.concatenate %0, %1 in 0 : vector<8x16xf32>, vector<8x16xf32> -> vector<16x16xf32>
    %c0_3 = arith.constant 0 : index
    %c0_4 = arith.constant 0 : index
    %3 = vector.load %arg2[%c0_3, %c0_4] : memref<16x32xf32, #tpu.memory_space<vmem>>, vector<16x32xf32>
    %4 = arith.truncf %2 : vector<16x16xf32> to vector<16x16xbf16>
    %5 = arith.truncf %3 : vector<16x32xf32> to vector<16x32xbf16>
    %cst = arith.constant dense<0.000000e+00> : vector<16x32xf32>
    %6 = tpu.matmul %4, %5, %cst {dimension_numbers = #tpu.dot_dimension_numbers<[1], [0], [0], [1], [0, 0, 1, 1], [], []>} : vector<16x16xbf16>, vector<16x32xbf16>, vector<16x32xf32> -> vector<16x32xf32>
    %c0_5 = arith.constant 0 : index
    %c0_6 = arith.constant 0 : index
    %7 = vector.load %arg3[%c0_5, %c0_6] : memref<1x32xf32, #tpu.memory_space<vmem>>, vector<1x32xf32>
    %8 = vector.broadcast %7 : vector<1x32xf32> to vector<16x32xf32>
    %9 = arith.addf %6, %8 : vector<16x32xf32>
    %c0_7 = arith.constant 0 : index
    %c0_8 = arith.constant 0 : index
    %10 = vector.load %arg4[%c0_7, %c0_8] : memref<32x16xf32, #tpu.memory_space<vmem>>, vector<32x16xf32>
    %11 = arith.truncf %9 : vector<16x32xf32> to vector<16x32xbf16>
    %12 = arith.truncf %10 : vector<32x16xf32> to vector<32x16xbf16>
    %cst_9 = arith.constant dense<0.000000e+00> : vector<16x16xf32>
    %13 = tpu.matmul %11, %12, %cst_9 {dimension_numbers = #tpu.dot_dimension_numbers<[1], [0], [0], [1], [0, 0, 1, 1], [], []>} : vector<16x32xbf16>, vector<32x16xbf16>, vector<16x16xf32> -> vector<16x16xf32>
    %c0_10 = arith.constant 0 : index
    %c0_11 = arith.constant 0 : index
    %14 = vector.load %arg5[%c0_10, %c0_11] : memref<1x16xf32, #tpu.memory_space<vmem>>, vector<1x16xf32>
    %15 = vector.broadcast %14 : vector<1x16xf32> to vector<16x16xf32>
    %16 = arith.addf %13, %15 : vector<16x16xf32>
    %17 = vector.extract_strided_slice %16 {offsets = [0, 0], sizes = [8, 16], strides = [1, 1]} : vector<16x16xf32> to vector<8x16xf32>
    %cst_12 = arith.constant dense<0.000000e+00> : vector<16xf32>
    %18 = vector.multi_reduction <add>, %17, %cst_12 [0] : vector<8x16xf32> to vector<16xf32>
    %19 = vector.shape_cast %18 : vector<16xf32> to vector<1x16xf32>
    %cst_13 = arith.constant 8.000000e+00 : f32
    %20 = vector.broadcast %cst_13 : f32 to vector<1x16xf32>
    %21 = arith.divf %19, %20 : vector<1x16xf32>
    %22 = vector.broadcast %21 : vector<1x16xf32> to vector<8x16xf32>
    %23 = arith.subf %17, %22 : vector<8x16xf32>
    %24 = vector.broadcast %21 : vector<1x16xf32> to vector<8x16xf32>
    %25 = arith.subf %17, %24 : vector<8x16xf32>
    %26 = arith.mulf %23, %25 : vector<8x16xf32>
    %cst_14 = arith.constant dense<0.000000e+00> : vector<16xf32>
    %27 = vector.multi_reduction <add>, %26, %cst_14 [0] : vector<8x16xf32> to vector<16xf32>
    %28 = vector.shape_cast %27 : vector<16xf32> to vector<1x16xf32>
    %cst_15 = arith.constant 8.000000e+00 : f32
    %29 = vector.broadcast %cst_15 : f32 to vector<1x16xf32>
    %30 = arith.divf %28, %29 : vector<1x16xf32>
    %31 = vector.broadcast %21 : vector<1x16xf32> to vector<8x16xf32>
    %32 = arith.subf %17, %31 : vector<8x16xf32>
    %cst_16 = arith.constant 9.99999974E-6 : f32
    %33 = vector.broadcast %cst_16 : f32 to vector<1x16xf32>
    %34 = arith.addf %30, %33 : vector<1x16xf32>
    %35 = math.rsqrt %34 : vector<1x16xf32>
    %36 = vector.broadcast %35 : vector<1x16xf32> to vector<8x16xf32>
    %37 = arith.mulf %32, %36 : vector<8x16xf32>
    %c0_17 = arith.constant 0 : index
    %c0_18 = arith.constant 0 : index
    %38 = vector.load %arg6[%c0_17, %c0_18] : memref<1x16xf32, #tpu.memory_space<vmem>>, vector<1x16xf32>
    %39 = vector.broadcast %38 : vector<1x16xf32> to vector<8x16xf32>
    %40 = arith.mulf %37, %39 : vector<8x16xf32>
    %c0_19 = arith.constant 0 : index
    %c0_20 = arith.constant 0 : index
    %41 = vector.load %arg7[%c0_19, %c0_20] : memref<1x16xf32, #tpu.memory_space<vmem>>, vector<1x16xf32>
    %42 = vector.broadcast %41 : vector<1x16xf32> to vector<8x16xf32>
    %43 = arith.addf %40, %42 : vector<8x16xf32>
    %44 = vector.extract_strided_slice %16 {offsets = [8, 0], sizes = [8, 16], strides = [1, 1]} : vector<16x16xf32> to vector<8x16xf32>
    %cst_21 = arith.constant dense<0.000000e+00> : vector<16xf32>
    %45 = vector.multi_reduction <add>, %44, %cst_21 [0] : vector<8x16xf32> to vector<16xf32>
    %46 = vector.shape_cast %45 : vector<16xf32> to vector<1x16xf32>
    %cst_22 = arith.constant 8.000000e+00 : f32
    %47 = vector.broadcast %cst_22 : f32 to vector<1x16xf32>
    %48 = arith.divf %46, %47 : vector<1x16xf32>
    %49 = vector.broadcast %48 : vector<1x16xf32> to vector<8x16xf32>
    %50 = arith.subf %44, %49 : vector<8x16xf32>
    %51 = vector.broadcast %48 : vector<1x16xf32> to vector<8x16xf32>
    %52 = arith.subf %44, %51 : vector<8x16xf32>
    %53 = arith.mulf %50, %52 : vector<8x16xf32>
    %cst_23 = arith.constant dense<0.000000e+00> : vector<16xf32>
    %54 = vector.multi_reduction <add>, %53, %cst_23 [0] : vector<8x16xf32> to vector<16xf32>
    %55 = vector.shape_cast %54 : vector<16xf32> to vector<1x16xf32>
    %cst_24 = arith.constant 8.000000e+00 : f32
    %56 = vector.broadcast %cst_24 : f32 to vector<1x16xf32>
    %57 = arith.divf %55, %56 : vector<1x16xf32>
    %58 = vector.broadcast %48 : vector<1x16xf32> to vector<8x16xf32>
    %59 = arith.subf %44, %58 : vector<8x16xf32>
    %cst_25 = arith.constant 9.99999974E-6 : f32
    %60 = vector.broadcast %cst_25 : f32 to vector<1x16xf32>
    %61 = arith.addf %57, %60 : vector<1x16xf32>
    %62 = math.rsqrt %61 : vector<1x16xf32>
    %63 = vector.broadcast %62 : vector<1x16xf32> to vector<8x16xf32>
    %64 = arith.mulf %59, %63 : vector<8x16xf32>
    %c0_26 = arith.constant 0 : index
    %c0_27 = arith.constant 0 : index
    %65 = vector.load %arg6[%c0_26, %c0_27] : memref<1x16xf32, #tpu.memory_space<vmem>>, vector<1x16xf32>
    %66 = vector.broadcast %65 : vector<1x16xf32> to vector<8x16xf32>
    %67 = arith.mulf %64, %66 : vector<8x16xf32>
    %c0_28 = arith.constant 0 : index
    %c0_29 = arith.constant 0 : index
    %68 = vector.load %arg7[%c0_28, %c0_29] : memref<1x16xf32, #tpu.memory_space<vmem>>, vector<1x16xf32>
    %69 = vector.broadcast %68 : vector<1x16xf32> to vector<8x16xf32>
    %70 = arith.addf %67, %69 : vector<8x16xf32>
    %71 = tpu.concatenate %43, %70 in 0 : vector<8x16xf32>, vector<8x16xf32> -> vector<16x16xf32>
    %cst_30 = arith.constant 0.000000e+00 : f32
    %72 = vector.broadcast %cst_30 : f32 to vector<16x16xf32>
    %73 = arith.maximumf %71, %72 : vector<16x16xf32>
    %c0_31 = arith.constant 0 : index
    %c0_32 = arith.constant 0 : index
    %74 = vector.load %arg8[%c0_31, %c0_32] : memref<16x32xf32, #tpu.memory_space<vmem>>, vector<16x32xf32>
    %75 = arith.truncf %73 : vector<16x16xf32> to vector<16x16xbf16>
    %76 = arith.truncf %74 : vector<16x32xf32> to vector<16x32xbf16>
    %cst_33 = arith.constant dense<0.000000e+00> : vector<16x32xf32>
    %77 = tpu.matmul %75, %76, %cst_33 {dimension_numbers = #tpu.dot_dimension_numbers<[1], [0], [0], [1], [0, 0, 1, 1], [], []>} : vector<16x16xbf16>, vector<16x32xbf16>, vector<16x32xf32> -> vector<16x32xf32>
    %c0_34 = arith.constant 0 : index
    %c0_35 = arith.constant 0 : index
    %78 = vector.load %arg9[%c0_34, %c0_35] : memref<1x32xf32, #tpu.memory_space<vmem>>, vector<1x32xf32>
    %79 = vector.broadcast %78 : vector<1x32xf32> to vector<16x32xf32>
    %80 = arith.addf %77, %79 : vector<16x32xf32>
    %81 = arith.mulf %80, %80 : vector<16x32xf32>
    %cst_36 = arith.constant dense<0.000000e+00> : vector<16xf32>
    %82 = vector.multi_reduction <add>, %81, %cst_36 [1] : vector<16x32xf32> to vector<16xf32>
    %83 = vector.shape_cast %82 : vector<16xf32> to vector<16x1xf32>
    %cst_37 = arith.constant 1.000000e-24 : f32
    %84 = vector.broadcast %cst_37 : f32 to vector<16x1xf32>
    %85 = arith.maximumf %83, %84 : vector<16x1xf32>
    %86 = math.rsqrt %85 : vector<16x1xf32>
    %87 = vector.broadcast %86 : vector<16x1xf32> to vector<16x32xf32>
    %88 = arith.mulf %80, %87 : vector<16x32xf32>
    %89 = arith.mulf %9, %9 : vector<16x32xf32>
    %cst_38 = arith.constant dense<0.000000e+00> : vector<16xf32>
    %90 = vector.multi_reduction <add>, %89, %cst_38 [1] : vector<16x32xf32> to vector<16xf32>
    %91 = vector.shape_cast %90 : vector<16xf32> to vector<16x1xf32>
    %cst_39 = arith.constant 1.000000e-24 : f32
    %92 = vector.broadcast %cst_39 : f32 to vector<16x1xf32>
    %93 = arith.maximumf %91, %92 : vector<16x1xf32>
    %94 = math.rsqrt %93 : vector<16x1xf32>
    %95 = vector.broadcast %94 : vector<16x1xf32> to vector<16x32xf32>
    %96 = arith.mulf %9, %95 : vector<16x32xf32>
    %97 = vector.extract_strided_slice %88 {offsets = [0, 0], sizes = [8, 32], strides = [1, 1]} : vector<16x32xf32> to vector<8x32xf32>
    %98 = vector.extract_strided_slice %88 {offsets = [8, 0], sizes = [8, 32], strides = [1, 1]} : vector<16x32xf32> to vector<8x32xf32>
    %99 = vector.extract_strided_slice %96 {offsets = [0, 0], sizes = [8, 32], strides = [1, 1]} : vector<16x32xf32> to vector<8x32xf32>
    %100 = vector.extract_strided_slice %96 {offsets = [8, 0], sizes = [8, 32], strides = [1, 1]} : vector<16x32xf32> to vector<8x32xf32>
    %c0_40 = arith.constant 0 : index
    %c0_41 = arith.constant 0 : index
    %101 = vector.load %arg10[%c0_40, %c0_41] : memref<32x64xf32, #tpu.memory_space<vmem>>, vector<32x64xf32>
    %102 = arith.mulf %101, %101 : vector<32x64xf32>
    %cst_42 = arith.constant dense<0.000000e+00> : vector<64xf32>
    %103 = vector.multi_reduction <add>, %102, %cst_42 [0] : vector<32x64xf32> to vector<64xf32>
    %104 = vector.shape_cast %103 : vector<64xf32> to vector<1x64xf32>
    %cst_43 = arith.constant 1.000000e-24 : f32
    %105 = vector.broadcast %cst_43 : f32 to vector<1x64xf32>
    %106 = arith.maximumf %104, %105 : vector<1x64xf32>
    %107 = math.rsqrt %106 : vector<1x64xf32>
    %108 = vector.broadcast %107 : vector<1x64xf32> to vector<32x64xf32>
    %109 = arith.mulf %101, %108 : vector<32x64xf32>
    %110 = arith.truncf %109 : vector<32x64xf32> to vector<32x64xbf16>
    %111 = arith.mulf %97, %100 : vector<8x32xf32>
    %cst_44 = arith.constant dense<0.000000e+00> : vector<8xf32>
    %112 = vector.multi_reduction <add>, %111, %cst_44 [1] : vector<8x32xf32> to vector<8xf32>
    %113 = vector.shape_cast %112 : vector<8xf32> to vector<8x1xf32>
    %114 = arith.mulf %98, %99 : vector<8x32xf32>
    %cst_45 = arith.constant dense<0.000000e+00> : vector<8xf32>
    %115 = vector.multi_reduction <add>, %114, %cst_45 [1] : vector<8x32xf32> to vector<8xf32>
    %116 = vector.shape_cast %115 : vector<8xf32> to vector<8x1xf32>
    %cst_46 = arith.constant 5.000000e+00 : f32
    %117 = vector.broadcast %cst_46 : f32 to vector<16x32xf32>
    %118 = arith.mulf %88, %117 : vector<16x32xf32>
    %119 = arith.truncf %118 : vector<16x32xf32> to vector<16x32xbf16>
    %cst_47 = arith.constant dense<0.000000e+00> : vector<16x64xf32>
    %120 = tpu.matmul %119, %110, %cst_47 {dimension_numbers = #tpu.dot_dimension_numbers<[1], [0], [0], [1], [0, 0, 1, 1], [], []>} : vector<16x32xbf16>, vector<32x64xbf16>, vector<16x64xf32> -> vector<16x64xf32>
    %121 = math.exp %120 : vector<16x64xf32>
    %cst_48 = arith.constant dense<0.000000e+00> : vector<16xf32>
    %122 = vector.multi_reduction <add>, %121, %cst_48 [1] : vector<16x64xf32> to vector<16xf32>
    %123 = vector.shape_cast %122 : vector<16xf32> to vector<16x1xf32>
    %124 = vector.extract_strided_slice %123 {offsets = [0, 0], sizes = [8, 1], strides = [1, 1]} : vector<16x1xf32> to vector<8x1xf32>
    %125 = vector.extract_strided_slice %123 {offsets = [8, 0], sizes = [8, 1], strides = [1, 1]} : vector<16x1xf32> to vector<8x1xf32>
    %cst_49 = arith.constant 5.000000e+00 : f32
    %126 = vector.broadcast %cst_49 : f32 to vector<8x1xf32>
    %127 = arith.mulf %113, %126 : vector<8x1xf32>
    %128 = math.exp %127 : vector<8x1xf32>
    %129 = arith.addf %128, %124 : vector<8x1xf32>
    %130 = math.log %129 : vector<8x1xf32>
    %cst_50 = arith.constant 5.000000e+00 : f32
    %131 = vector.broadcast %cst_50 : f32 to vector<8x1xf32>
    %132 = arith.mulf %113, %131 : vector<8x1xf32>
    %133 = arith.subf %130, %132 : vector<8x1xf32>
    %134 = vector.shape_cast %133 : vector<8x1xf32> to vector<1x8x1xf32>
    %cst_51 = arith.constant dense<0.000000e+00> : vector<1xf32>
    %135 = vector.multi_reduction <add>, %134, %cst_51 [1, 2] : vector<1x8x1xf32> to vector<1xf32>
    %136 = vector.shape_cast %135 : vector<1xf32> to vector<1x1x1xf32>
    %137 = vector.extract %136[0, 0, 0] : f32 from vector<1x1x1xf32>
    %cst_52 = arith.constant 8.000000e+00 : f32
    %138 = arith.divf %137, %cst_52 : f32
    %cst_53 = arith.constant 5.000000e+00 : f32
    %139 = vector.broadcast %cst_53 : f32 to vector<8x1xf32>
    %140 = arith.mulf %116, %139 : vector<8x1xf32>
    %141 = math.exp %140 : vector<8x1xf32>
    %142 = arith.addf %141, %125 : vector<8x1xf32>
    %143 = math.log %142 : vector<8x1xf32>
    %cst_54 = arith.constant 5.000000e+00 : f32
    %144 = vector.broadcast %cst_54 : f32 to vector<8x1xf32>
    %145 = arith.mulf %116, %144 : vector<8x1xf32>
    %146 = arith.subf %143, %145 : vector<8x1xf32>
    %147 = vector.shape_cast %146 : vector<8x1xf32> to vector<1x8x1xf32>
    %cst_55 = arith.constant dense<0.000000e+00> : vector<1xf32>
    %148 = vector.multi_reduction <add>, %147, %cst_55 [1, 2] : vector<1x8x1xf32> to vector<1xf32>
    %149 = vector.shape_cast %148 : vector<1xf32> to vector<1x1x1xf32>
    %150 = vector.extract %149[0, 0, 0] : f32 from vector<1x1x1xf32>
    %cst_56 = arith.constant 8.000000e+00 : f32
    %151 = arith.divf %150, %cst_56 : f32
    %152 = arith.addf %138, %151 : f32
    %cst_57 = arith.constant 5.000000e-01 : f32
    %153 = arith.mulf %cst_57, %152 : f32
    %cst_58 = arith.constant 5.000000e+00 : f32
    %154 = vector.broadcast %cst_58 : f32 to vector<32x64xf32>
    %155 = arith.mulf %109, %154 : vector<32x64xf32>
    %156 = arith.truncf %155 : vector<32x64xf32> to vector<32x64xbf16>
    %cst_59 = arith.constant dense<0.000000e+00> : vector<64x64xf32>
    %157 = tpu.matmul %156, %110, %cst_59 {dimension_numbers = #tpu.dot_dimension_numbers<[0], [0], [1], [1], [0, 1, 1, 1], [], []>} : vector<32x64xbf16>, vector<32x64xbf16>, vector<64x64xf32> -> vector<64x64xf32>
    %158 = math.exp %157 : vector<64x64xf32>
    %cst_60 = arith.constant dense<0.000000e+00> : vector<64xf32>
    %159 = vector.multi_reduction <add>, %158, %cst_60 [1] : vector<64x64xf32> to vector<64xf32>
    %160 = vector.shape_cast %159 : vector<64xf32> to vector<64x1xf32>
    %cst_61 = arith.constant 148.413162 : f32
    %161 = vector.broadcast %cst_61 : f32 to vector<64x1xf32>
    %162 = arith.subf %160, %161 : vector<64x1xf32>
    %163 = math.log %162 : vector<64x1xf32>
    %164 = vector.shape_cast %163 : vector<64x1xf32> to vector<1x64x1xf32>
    %cst_62 = arith.constant dense<0.000000e+00> : vector<1xf32>
    %165 = vector.multi_reduction <add>, %164, %cst_62 [1, 2] : vector<1x64x1xf32> to vector<1xf32>
    %166 = vector.shape_cast %165 : vector<1xf32> to vector<1x1x1xf32>
    %167 = vector.extract %166[0, 0, 0] : f32 from vector<1x1x1xf32>
    %cst_63 = arith.constant 6.400000e+01 : f32
    %168 = arith.divf %167, %cst_63 : f32
    %cst_64 = arith.constant 5.000000e+00 : f32
    %169 = arith.subf %168, %cst_64 : f32
    %170 = arith.mulf %101, %101 : vector<32x64xf32>
    %cst_65 = arith.constant dense<0.000000e+00> : vector<32xf32>
    %171 = vector.multi_reduction <add>, %170, %cst_65 [1] : vector<32x64xf32> to vector<32xf32>
    %172 = vector.shape_cast %171 : vector<32xf32> to vector<32x1xf32>
    %cst_66 = arith.constant 1.000000e-24 : f32
    %173 = vector.broadcast %cst_66 : f32 to vector<32x1xf32>
    %174 = arith.maximumf %172, %173 : vector<32x1xf32>
    %175 = math.rsqrt %174 : vector<32x1xf32>
    %176 = vector.broadcast %175 : vector<32x1xf32> to vector<32x64xf32>
    %177 = arith.mulf %101, %176 : vector<32x64xf32>
    %cst_67 = arith.constant 5.000000e+00 : f32
    %178 = vector.broadcast %cst_67 : f32 to vector<32x64xf32>
    %179 = arith.mulf %177, %178 : vector<32x64xf32>
    %180 = arith.truncf %179 : vector<32x64xf32> to vector<32x64xbf16>
    %181 = arith.truncf %177 : vector<32x64xf32> to vector<32x64xbf16>
    %cst_68 = arith.constant dense<0.000000e+00> : vector<32x32xf32>
    %182 = tpu.matmul %180, %181, %cst_68 {dimension_numbers = #tpu.dot_dimension_numbers<[1], [1], [0], [0], [0, 0, 1, 0], [], []>} : vector<32x64xbf16>, vector<32x64xbf16>, vector<32x32xf32> -> vector<32x32xf32>
    %183 = math.exp %182 : vector<32x32xf32>
    %cst_69 = arith.constant dense<0.000000e+00> : vector<32xf32>
    %184 = vector.multi_reduction <add>, %183, %cst_69 [1] : vector<32x32xf32> to vector<32xf32>
    %185 = vector.shape_cast %184 : vector<32xf32> to vector<32x1xf32>
    %cst_70 = arith.constant 148.413162 : f32
    %186 = vector.broadcast %cst_70 : f32 to vector<32x1xf32>
    %187 = arith.subf %185, %186 : vector<32x1xf32>
    %188 = math.log %187 : vector<32x1xf32>
    %189 = vector.shape_cast %188 : vector<32x1xf32> to vector<1x32x1xf32>
    %cst_71 = arith.constant dense<0.000000e+00> : vector<1xf32>
    %190 = vector.multi_reduction <add>, %189, %cst_71 [1, 2] : vector<1x32x1xf32> to vector<1xf32>
    %191 = vector.shape_cast %190 : vector<1xf32> to vector<1x1x1xf32>
    %192 = vector.extract %191[0, 0, 0] : f32 from vector<1x1x1xf32>
    %cst_72 = arith.constant 3.200000e+01 : f32
    %193 = arith.divf %192, %cst_72 : f32
    %cst_73 = arith.constant 5.000000e+00 : f32
    %194 = arith.subf %193, %cst_73 : f32
    %195 = tpu.iota {dimensions = array<i32: 1>} : vector<1x128xi32>
    %c0_i32 = arith.constant 0 : i32
    %196 = vector.broadcast %c0_i32 : i32 to vector<1x128xi32>
    %197 = arith.cmpi eq, %195, %196 : vector<1x128xi32>
    %198 = arith.extui %197 : vector<1x128xi1> to vector<1x128xi32>
    %199 = arith.sitofp %198 : vector<1x128xi32> to vector<1x128xf32>
    %200 = vector.broadcast %153 : f32 to vector<1x128xf32>
    %201 = arith.mulf %200, %199 : vector<1x128xf32>
    %c1_i32 = arith.constant 1 : i32
    %202 = vector.broadcast %c1_i32 : i32 to vector<1x128xi32>
    %203 = arith.cmpi eq, %195, %202 : vector<1x128xi32>
    %204 = arith.extui %203 : vector<1x128xi1> to vector<1x128xi32>
    %205 = arith.sitofp %204 : vector<1x128xi32> to vector<1x128xf32>
    %206 = vector.broadcast %169 : f32 to vector<1x128xf32>
    %207 = arith.mulf %206, %205 : vector<1x128xf32>
    %208 = arith.addf %201, %207 : vector<1x128xf32>
    %c2_i32 = arith.constant 2 : i32
    %209 = vector.broadcast %c2_i32 : i32 to vector<1x128xi32>
    %210 = arith.cmpi eq, %195, %209 : vector<1x128xi32>
    %211 = arith.extui %210 : vector<1x128xi1> to vector<1x128xi32>
    %212 = arith.sitofp %211 : vector<1x128xi32> to vector<1x128xf32>
    %213 = vector.broadcast %194 : f32 to vector<1x128xf32>
    %214 = arith.mulf %213, %212 : vector<1x128xf32>
    %215 = arith.addf %208, %214 : vector<1x128xf32>
    %c0_74 = arith.constant 0 : index
    %c0_75 = arith.constant 0 : index
    %216 = vector.load %arg11[%c0_74, %c0_75] : memref<1x128xf32, #tpu.memory_space<vmem>>, vector<1x128xf32>
    tpu.vector_store %arg11[%c0_74, %c0_75], %215 {strides = array<i32>} : memref<1x128xf32, #tpu.memory_space<vmem>>, vector<1x128xf32>,
    return
  }
}

</mosaic_0001>

<bundles_post_ra>
// kernel: graphacl_forward.1
= control target key start
LH: loop header
LB: loop body
LE: loop exit
PB: predicated region body
PF: predicated region fallthrough
CT: control target
= control target key end

     0   :  { %16 = vsyncpa [#allocation3], 0  ;;  %s1223_s0 = inlined_call_operand.vmem [shape: f32[8,16], index: 0, kind: input, shape index: {}]   ;;  %s1224_s1 = inlined_call_operand.hbm [shape: f32[8,16], index: 1, kind: input, shape index: {}]   ;;  %s1225_s2 = inlined_call_operand.vmem [shape: f32[16,32], index: 2, kind: input, shape index: {}]   ;;  %s1226_s3 = inlined_call_operand.vmem [shape: f32[1,32], index: 3, kind: input, shape index: {}]   ;;  %s1227_s4 = inlined_call_operand.vmem [shape: f32[32,16], index: 4, kind: input, shape index: {}]   ;;  %s1228_s5 = inlined_call_operand.vmem [shape: f32[1,16], index: 5, kind: input, shape index: {}]   ;;  %s1229_s6 = inlined_call_operand.vmem [shape: f32[1,16], index: 6, kind: input, shape index: {}]   ;;  %s1230_s7 = inlined_call_operand.vmem [shape: f32[1,16], index: 7, kind: input, shape index: {}]   ;;  %s1231_s8 = inlined_call_operand.hbm [shape: f32[16,32], index: 8, kind: input, shape index: {}]   ;;  %s1232_s9 = inlined_call_operand.vmem [shape: f32[1,32], index: 9, kind: input, shape index: {}]   ;;  %s1233_s10 = inlined_call_operand.vmem [shape: f32[32,64], index: 10, kind: input, shape index: {}]   ;;  %s1234_s11 = inlined_call_operand.vmem [shape: f32[1,128], index: 11, kind: output, shape index: {}]  }
   0x1   :  { %s25_s19 = sshll.u32 %s1224_s1, 4  ;;  %s26_s19 = int_to_ptr.hbm [resolvable:$true] %s25_s19 }
   0x2   :  { %17 = vsyncpa [#allocation5], 0  ;;  %s965_s20 = smov [#allocation2]   ;;  %s47_s24 = sshll.u32 %s1231_s8, 4  ;;  %s48_s24 = int_to_ptr.hbm [resolvable:$true] %s47_s24 }
   0x3   :  { %s27_s21 = sshll.u32 %s965_s20, 4  ;;  %s966_s25 = smov [#allocation4]   ;;  %s28_s21 = int_to_ptr.vmem [resolvable:$true] %s27_s21 }
   0x4   :  { %30 = dma.hbm_to_vmem [thread:$0]  %s26_s19, 128, %s28_s21, [#allocation3]  }
   0x5   :  { %s49_s26 = sshll.u32 %s966_s25, 4  ;;  %s967_s27 = smov 128   ;;  %s50_s26 = int_to_ptr.vmem [resolvable:$true] %s49_s26 }
   0x6   :  { %s968_s28 = smov 8  }
   0x7   :  { %55 = dma.hbm_to_vmem [thread:$0]  %s48_s24, 256, %s50_s26, [#allocation5], %s967_s27, %s967_s27, %s968_s28  }
   0x8   :  { %961 = dma.done.wait [#allocation3], 128  }
   0x9   :  { %962 = vsyncadd [#allocation3], 4294967168 }
   0xa   :  { %963 = dma.done.wait [#allocation5], 256  }
   0xb   :  { %964 = vsyncadd [#allocation5], 4294967040  ;;  %v71_v0 = vld [vmem:[%s1225_s2] sm:$0xff]  ;;  %v72_v1 = vld [vmem:[%s1225_s2 + $0x8] sm:$0xff]  ;;  %vm304_vm0 = vcmask 523264   ;;  %vm79_vm1 = vcmask 130048  }
   0xc   :  { %v69_v2 = vld [vmem:[%s1223_s0] sm:$0xff]  ;;  %v74_v3 = vpack.c.bf16 %v72_v1, %v71_v0  ;;  %v1056_v6 = vld [vmem:[%s1233_s10 + $0x8] sm:$0xff]  ;;  %v99_v13 = vld [vmem:[%s1227_s4 + $0x10] sm:$0xff]  ;;  %vm108_vm2 = vcmask 261120   ;;  %v969_v59 = vmov 8.0  }
   0xd   :  { %v70_v4 = vld [vmem:[#allocation2] sm:$0xff]  ;;  %v301_v9 = vmul.f32 %v1056_v6, %v1056_v6  ;;  %v100_v14 = vld [vmem:[%s1227_s4 + $0x18] sm:$0xff]  ;;  %v98_v17 = vld [vmem:[%s1227_s4 + $0x8] sm:$0xff] }
   0xe   :  { %v1051_v5 = vld [vmem:[%s1233_s10] sm:$0xff]  ;;  %v73_v7 = vpack.c.bf16 %v70_v4, %v69_v2  ;;  %90 = vmatpush.bf16.msra.mxu0 %v74_v3  ;;  %v103_v15 = vpack.c.bf16 %v100_v14, %v99_v13  ;;  %v1080_v19 = vld [vmem:[%s1233_s10 + $0x10] sm:$0xff]  ;;  %v1087_v21 = vld [vmem:[%s1233_s10 + $0x18] sm:$0xff] }
   0xf   :  { %v300_v8 = vmul.f32 %v1051_v5, %v1051_v5  ;;  %v306_v11 = vsel %vm304_vm0, %v301_v9, 0.0  ;;  %v97_v16 = vld [vmem:[%s1227_s4] sm:$0xff]  ;;  %v302_v20 = vmul.f32 %v1080_v19, %v1080_v19  ;;  %v303_v24 = vmul.f32 %v1087_v21, %v1087_v21 }
  0x10   :  { %118 = vmatpush.bf16.msra.mxu3 %v103_v15  ;;  %v102_v18 = vpack.c.bf16 %v98_v17, %v97_v16  ;;  %v820_v26 = vld [vmem:[%s1226_s3] ss:$0 sm:$0xff] }
  0x11   :  { %v305_v10 = vsel %vm304_vm0, %v300_v8, 0.0  ;;  %768 = vmatmul.msk.bf16.vlgmr.msra.gmra.mxu0 %vm79_vm1, %v73_v7  ;;  %v308_v22 = vsel %vm304_vm0, %v302_v20, 0.0  ;;  %v310_v25 = vsel %vm304_vm0, %v303_v24, 0.0  ;;  %v821_v61 = vld [vmem:[%s1228_s5] ss:$0 sm:$0xff] }
  0x12   :  { %589 = vadd.xlane.f32.xlu1 %v305_v10  ;;  %v307_v12 = vadd.f32 %v306_v11, %v305_v10  ;;  %593 = vadd.xlane.f32.xlu0 %v308_v22 }
  0x14   :  { %119 = vmatpush.bf16.msra.mxu3 %v102_v18  ;;  %v309_v23 = vadd.f32 %v308_v22, %v307_v12 }
  0x16   :  { %v311_v34 = vadd.f32 %v310_v25, %v309_v23 }
  0x18   :  { %v312_v35 = vrot.slane %v311_v34, 4 }
  0x1a   :  { %591 = vadd.xlane.f32.xlu1 %v306_v11  ;;  %595 = vadd.xlane.f32.xlu0 %v310_v25  ;;  %v313_v36 = vadd.f32 %v312_v35, %v311_v34 }
  0x1c   :  { %v314_v37 = vrot.slane %v313_v36, 2 }
  0x1e   :  { %v315_v38 = vadd.f32 %v314_v37, %v313_v36 }
  0x20   :  { %v316_v39 = vrot.slane %v315_v38, 1 }
  0x22   :  { %v317_v40 = vadd.f32 %v316_v39, %v315_v38 }
  0x24   :  { %v318_v41 = vmax.f32 %v317_v40, 1e-24 }
  0x26   :  { %825 = vrsqrt.f32 %v318_v41  ;;  %vm325_vm3 = vweird.f32 %v318_v41 }
  0x27   :  { %827 = vrcp.f32 %v969_v59 }
  0x2c   :  { %v826_v42 = vpop.eup %825 }
  0x2d   :  { %v320_v43 = vmul.f32 %v826_v42, %v318_v41  ;;  %vm326_vm4 = vweird.f32 %v826_v42  ;;  %v828_v60 = vpop.eup %827 }
  0x2e   :  { %vm327_vm5 = vmor %vm325_vm3, %vm326_vm4  ;;  %v134_v62 = vmul.f32 8.0, %v828_v60  ;;  %vm138_vm6 = vweird.f32 %v828_v60 }
  0x2f   :  { %v321_v44 = vmul.f32 %v826_v42, %v320_v43 }
  0x30   :  { %v135_v1 = vsub.f32 1.0, %v134_v62 }
  0x31   :  { %v322_v45 = vmul.f32 0.5, %v321_v44 }
  0x32   :  { %v136_v4 = vmul.f32 %v828_v60, %v135_v1 }
  0x33   :  { %v323_v46 = vsub.f32 1.5, %v322_v45  ;;  %v207_v45 = vld [vmem:[#allocation4] sm:$0xff] }
  0x34   :  { %v137_v10 = vadd.f32 %v828_v60, %v136_v4 }
  0x35   :  { %v324_v47 = vmul.f32 %v826_v42, %v323_v46  ;;  %v208_v46 = vld [vmem:[#allocation4 + $0x8] sm:$0xff] }
  0x36   :  { %v1124_v16 = vsel %vm138_vm6, %v828_v60, %v137_v10 }
  0x37   :  { %v328_v48 = vsel %vm327_vm5, %v826_v42, %v324_v47  ;;  %v210_v47 = vpack.c.bf16 %v208_v46, %v207_v45 }
  0x38   :  { %v1107_v49 = vmul.f32 %v328_v48, %v1051_v5  ;;  %v1110_v50 = vmul.f32 %v328_v48, %v1056_v6  ;;  %v1115_v54 = vmul.f32 %v328_v48, %v1087_v21  ;;  %v331_v55 = vmul.f32 %v328_v48, %v1080_v19 }
  0x39   :  { %225 = vmatpush.bf16.msra.mxu2 %v210_v47 }
  0x3a   :  { %v428_v51 = vmul.f32 5.0, %v1107_v49  ;;  %v429_v52 = vmul.f32 5.0, %v1110_v50  ;;  %v430_v56 = vmul.f32 5.0, %v331_v55  ;;  %v431_v57 = vmul.f32 5.0, %v1115_v54 }
  0x3b   :  { %v333_v62 = vpack.c.bf16 %v1110_v50, %v1107_v49 }
  0x3c   :  { %v432_v53 = vpack.c.bf16 %v429_v52, %v428_v51  ;;  %v433_v58 = vpack.c.bf16 %v431_v57, %v430_v56 }
  0x43   :  { %434 = vxpose.xlu0.c.b16.start [1/2] (short) (narrow) %v432_v53, 64 }
  0x53   :  { %435 = vxpose.xlu0.c.b16.end [2/2] (short) (narrow) %v433_v58, 64  ;;  %v334_v58 = vpack.c.bf16 %v1115_v54, %v331_v55 }
  0x55   :  { %468 = vmatpush.bf16.msrb.mxu0 %v334_v58  ;;  %795 = vmatpush.bf16.msra.mxu1 %v334_v58 }
  0x56   :  { %355 = vmatpush.bf16.msrb.mxu3 %v334_v58 }
  0x59   :  { %469 = vmatpush.bf16.msrb.mxu0 %v333_v62  ;;  %796 = vmatpush.bf16.msra.mxu1 %v333_v62 }
  0x5a   :  { %356 = vmatpush.bf16.msrb.mxu3 %v333_v62 }
  0x85   :  { %v594_v57 = vpop.xlane.xlu0 %593  ;;  %v590_v1 = vpop.xlane.xlu1 %589 }
  0x86   :  { %v599_v59 = vmax.f32 %v594_v57, 1e-24 }
  0x88   :  { %vm627_vm11 = vweird.f32 %v599_v59 }
  0x8e   :  { %v92_v27 = vpop.f32.mrf.mxu0 }
  0x8f   :  { %v1096_v28 = vadd.f32 %v820_v26, %v92_v27 }
  0x91   :  { %v264_v29 = vmul.f32 %v1096_v28, %v1096_v28 }
  0x93   :  { %v266_v30 = vsel %vm108_vm2, %v264_v29, 0.0 }
  0x94   :  { %267 = vadd.xlane.f32.xlu1 %v266_v30 }
  0x96   :  { %v94_v31 = vpop.f32.mrf.mxu0 }
  0x97   :  { %v1101_v32 = vadd.f32 %v820_v26, %v94_v31 }
  0x99   :  { %v101_v33 = vpack.c.bf16 %v1101_v32, %v1096_v28 }
  0x9b   :  { %769 = vmatmul.msk.bf16.vlgmr.msra.gmra.mxu3 %vm108_vm2, %v101_v33 }
 0x11e   :  { %v121_v63 = vpop.f32.mrf.mxu3 }
 0x11f   :  { %v122_v0 = vadd.f32 %v821_v61, %v121_v63 }
 0x121   :  { %v126_v2 = vsel %vm79_vm1, %v122_v0, 0.0 }
 0x122   :  { %v127_v3 = vrot.slane %v126_v2, 4 }
 0x124   :  { %v128_v7 = vadd.f32 %v127_v3, %v126_v2  ;;  %v596_v3 = vpop.xlane.xlu0 %595 }
 0x125   :  { %v600_v4 = vmax.f32 %v596_v3, 1e-24 }
 0x126   :  { %v129_v8 = vrot.slane %v128_v7, 2  ;;  %v123_v9 = vpop.f32.mrf.mxu3 }
 0x127   :  { %v124_v11 = vadd.f32 %v821_v61, %v123_v9  ;;  %vm637_vm3 = vweird.f32 %v600_v4 }
 0x128   :  { %v130_v12 = vadd.f32 %v129_v8, %v128_v7 }
 0x129   :  { %v173_v13 = vsel %vm79_vm1, %v124_v11, 0.0 }
 0x12a   :  { %v131_v14 = vrot.slane %v130_v12, 1  ;;  %v174_v15 = vrot.slane %v173_v13, 4 }
 0x12c   :  { %v132_v17 = vadd.f32 %v131_v14, %v130_v12  ;;  %v175_v18 = vadd.f32 %v174_v15, %v173_v13  ;;  %v597_v14 = vmax.f32 %v590_v1, 1e-24  ;;  %v592_v15 = vpop.xlane.xlu1 %591 }
 0x12e   :  { %v140_v20 = vmul.f32 %v1124_v16, %v132_v17  ;;  %v176_v22 = vrot.slane %v175_v18, 2  ;;  %vm607_vm6 = vweird.f32 %v597_v14 }
 0x130   :  { %v1127_v23 = vsub.f32 %v122_v0, %v140_v20  ;;  %v177_v24 = vadd.f32 %v176_v22, %v175_v18  ;;  %v822_v18 = vld [vmem:[%s1229_s6] ss:$0 sm:$0xff] }
 0x132   :  { %v142_v25 = vmul.f32 %v1127_v23, %v1127_v23  ;;  %v178_v26 = vrot.slane %v177_v24, 1 }
 0x134   :  { %v143_v27 = vsel %vm79_vm1, %v142_v25, 0.0  ;;  %v179_v29 = vadd.f32 %v178_v26, %v177_v24  ;;  %v598_v24 = vmax.f32 %v592_v15, 1e-24 }
 0x135   :  { %v144_v30 = vrot.slane %v143_v27, 4 }
 0x136   :  { %v180_v31 = vmul.f32 %v179_v29, %v1124_v16 }
 0x137   :  { %v145_v33 = vadd.f32 %v144_v30, %v143_v27 }
 0x138   :  { %v1133_v34 = vsub.f32 %v124_v11, %v180_v31 }
 0x139   :  { %v146_v35 = vrot.slane %v145_v33, 2 }
 0x13a   :  { %v182_v36 = vmul.f32 %v1133_v34, %v1133_v34 }
 0x13b   :  { %v147_v37 = vadd.f32 %v146_v35, %v145_v33 }
 0x13c   :  { %v183_v38 = vsel %vm79_vm1, %v182_v36, 0.0 }
 0x13d   :  { %v148_v39 = vrot.slane %v147_v37, 1  ;;  %v184_v40 = vrot.slane %v183_v38, 4 }
 0x13f   :  { %v149_v41 = vadd.f32 %v148_v39, %v147_v37  ;;  %v185_v42 = vadd.f32 %v184_v40, %v183_v38 }
 0x141   :  { %v150_v43 = vmul.f32 %v149_v41, %v1124_v16  ;;  %v186_v44 = vrot.slane %v185_v42, 2 }
 0x143   :  { %v151_v48 = vadd.f32 1e-05, %v150_v43  ;;  %v187_v51 = vadd.f32 %v186_v44, %v185_v42 }
 0x145   :  { %829 = vrsqrt.f32 %v151_v48  ;;  %v188_v52 = vrot.slane %v187_v51, 1  ;;  %vm158_vm8 = vweird.f32 %v151_v48 }
 0x146   :  { %831 = vrsqrt.f32 %v599_v59 }
 0x147   :  { %v189_v53 = vadd.f32 %v188_v52, %v187_v51 }
 0x149   :  { %v190_v56 = vmul.f32 %v189_v53, %v1124_v16 }
 0x14b   :  { %v830_v60 = vpop.eup %829  ;;  %v191_v61 = vadd.f32 1e-05, %v190_v56 }
 0x14c   :  { %v153_v63 = vmul.f32 %v830_v60, %v151_v48  ;;  %v832_v54 = vpop.eup %831  ;;  %vm159_vm7 = vweird.f32 %v830_v60 }
 0x14d   :  { %833 = vrsqrt.f32 %v191_v61  ;;  %v622_v8 = vmul.f32 %v832_v54, %v599_v59  ;;  %vm160_vm9 = vmor %vm158_vm8, %vm159_vm7  ;;  %vm628_vm12 = vweird.f32 %v832_v54  ;;  %vm198_vm13 = vweird.f32 %v191_v61 }
 0x14e   :  { %v154_v0 = vmul.f32 %v830_v60, %v153_v63  ;;  %835 = vrsqrt.f32 %v600_v4  ;;  %vm629_vm15 = vmor %vm627_vm11, %vm628_vm12  ;;  %vm617_vm8 = vweird.f32 %v598_v24 }
 0x14f   :  { %v623_v50 = vmul.f32 %v832_v54, %v622_v8  ;;  %837 = vrsqrt.f32 %v597_v14 }
 0x150   :  { %v155_v2 = vmul.f32 0.5, %v154_v0  ;;  %839 = vrsqrt.f32 %v598_v24 }
 0x151   :  { %v624_v12 = vmul.f32 0.5, %v623_v50 }
 0x152   :  { %v156_v55 = vsub.f32 1.5, %v155_v2 }
 0x153   :  { %v834_v7 = vpop.eup %833  ;;  %v625_v20 = vsub.f32 1.5, %v624_v12  ;;  %v824_v12 = vld [vmem:[%s1232_s9] ss:$0 sm:$0xff] }
 0x154   :  { %v157_v9 = vmul.f32 %v830_v60, %v156_v55  ;;  %v193_v49 = vmul.f32 %v834_v7, %v191_v61  ;;  %v836_v22 = vpop.eup %835  ;;  %vm199_vm10 = vweird.f32 %v834_v7 }
 0x155   :  { %v632_v26 = vmul.f32 %v836_v22, %v600_v4  ;;  %vm200_vm14 = vmor %vm198_vm13, %vm199_vm10  ;;  %v626_v31 = vmul.f32 %v832_v54, %v625_v20  ;;  %vm638_vm4 = vweird.f32 %v836_v22  ;;  %v838_v41 = vpop.eup %837 }
 0x156   :  { %v161_v10 = vsel %vm160_vm9, %v830_v60, %v157_v9  ;;  %v194_v11 = vmul.f32 %v834_v7, %v193_v49  ;;  %vm639_vm5 = vmor %vm637_vm3, %vm638_vm4  ;;  %v840_v44 = vpop.eup %839  ;;  %v602_v52 = vmul.f32 %v838_v41, %v597_v14  ;;  %vm608_vm7 = vweird.f32 %v838_v41  ;;  %v442_v9 = vpop.trf.xlu0 }
 0x157   :  { %v162_v17 = vmul.f32 %v161_v10, %v1127_v23  ;;  %v823_v23 = vld [vmem:[%s1230_s7] ss:$0 sm:$0xff]  ;;  %v633_v30 = vmul.f32 %v836_v22, %v632_v26  ;;  %v630_v40 = vsel %vm629_vm15, %v832_v54, %v626_v31  ;;  %v612_v53 = vmul.f32 %v840_v44, %v598_v24  ;;  %vm609_vm10 = vmor %vm607_vm6, %vm608_vm7  ;;  %772 = vmatmul.msk.bf16.vlgmr.msrb.gmra.mxu0 %vm108_vm2, %v442_v9 }
 0x158   :  { %v195_v13 = vmul.f32 0.5, %v194_v11  ;;  %v643_v45 = vmul.f32 %v630_v40, %v1080_v19  ;;  %v603_v58 = vmul.f32 %v838_v41, %v602_v52  ;;  %vm618_vm9 = vweird.f32 %v840_v44 }
 0x159   :  { %v167_v29 = vmul.f32 %v822_v18, %v162_v17  ;;  %v634_v36 = vmul.f32 0.5, %v633_v30  ;;  %v613_v59 = vmul.f32 %v840_v44, %v612_v53  ;;  %vm619_vm11 = vmor %vm617_vm8, %vm618_vm9 }
 0x15a   :  { %v196_v25 = vsub.f32 1.5, %v195_v13  ;;  %v604_v60 = vmul.f32 0.5, %v603_v58  ;;  %v647_v49 = vmul.f32 5.0, %v643_v45 }
 0x15b   :  { %v172_v38 = vadd.f32 %v823_v23, %v167_v29  ;;  %v635_v39 = vsub.f32 1.5, %v634_v36  ;;  %v614_v61 = vmul.f32 0.5, %v613_v59 }
 0x15c   :  { %v197_v27 = vmul.f32 %v834_v7, %v196_v25  ;;  %v605_v19 = vsub.f32 1.5, %v604_v60  ;;  %v265_v25 = vmul.f32 %v1101_v32, %v1101_v32 }
 0x15d   :  { %v636_v43 = vmul.f32 %v836_v22, %v635_v39  ;;  %v205_v46 = vmax.f32 %v172_v38, 0.0  ;;  %v615_v62 = vsub.f32 1.5, %v614_v61 }
 0x15e   :  { %v201_v33 = vsel %vm200_vm14, %v834_v7, %v197_v27  ;;  %v269_v26 = vsel %vm108_vm2, %v265_v25, 0.0 }
 0x15f   :  { %v202_v35 = vmul.f32 %v201_v33, %v1133_v34  ;;  %v640_v48 = vsel %vm639_vm5, %v836_v22, %v636_v43  ;;  %v616_v63 = vmul.f32 %v840_v44, %v615_v62 }
 0x160   :  { %v644_v51 = vmul.f32 %v640_v48, %v1087_v21  ;;  %v606_v21 = vmul.f32 %v838_v41, %v605_v19 }
 0x161   :  { %v203_v37 = vmul.f32 %v822_v18, %v202_v35  ;;  %v620_v1 = vsel %vm619_vm11, %v840_v44, %v616_v63 }
 0x162   :  { %v652_v56 = vpack.c.bf16 %v644_v51, %v643_v45  ;;  %v610_v0 = vsel %vm609_vm10, %v838_v41, %v606_v21  ;;  %v642_v3 = vmul.f32 %v620_v1, %v1056_v6  ;;  %v648_v50 = vmul.f32 5.0, %v644_v51 }
 0x163   :  { %v204_v42 = vadd.f32 %v823_v23, %v203_v37  ;;  %v641_v2 = vmul.f32 %v610_v0, %v1051_v5  ;;  %v443_v5 = vpop.trf.xlu0 }
 0x164   :  { %v663_v57 = vsel %vm304_vm0, %v652_v56, 0  ;;  %v646_v7 = vmul.f32 5.0, %v642_v3  ;;  %v650_v10 = vpack.c.bf16 %v648_v50, %v647_v49 }
 0x165   :  { %v206_v47 = vmax.f32 %v204_v42, 0.0  ;;  %671 = vmatpush.bf16.xpose.msrb.mxu2 %v663_v57  ;;  %v651_v54 = vpack.c.bf16 %v642_v3, %v641_v2  ;;  %v645_v4 = vmul.f32 5.0, %v641_v2 }
 0x167   :  { %v209_v34 = vpack.c.bf16 %v206_v47, %v205_v46  ;;  %v660_v55 = vsel %vm304_vm0, %v651_v54, 0  ;;  %v649_v8 = vpack.c.bf16 %v646_v7, %v645_v4  ;;  %773 = vmatmul.msk.bf16.gmra.mxu0 %vm108_vm2, %v443_v5  ;;  %v268_v4 = vpop.xlane.xlu1 %267 }
 0x168   :  { %v272_v7 = vmax.f32 %v268_v4, 1e-24 }
 0x169   :  { %770 = vmatmul.msk.bf16.vlgmr.msra.gmra.mxu2 %vm79_vm1, %v209_v34 }
 0x16a   :  { %vm280_vm15 = vweird.f32 %v272_v7 }
 0x16b   :  { %v444_v6 = vpop.trf.xlu0 }
 0x16c   :  { %774 = vmatmul.msk.bf16.vlgmr.msra.gmra.mxu1 %vm108_vm2, %v444_v6 }
 0x16d   :  { %672 = vmatpush.bf16.xpose.msrb.mxu2 %v660_v55 }
 0x173   :  { %v445_v11 = vpop.trf.xlu0 }
 0x179   :  { %785 = vmatmul.msk.bf16.vlgmr.msrb.gmra.mxu2 %vm304_vm0, %v649_v8 }
 0x17c   :  { %775 = vmatmul.msk.bf16.gmra.mxu1 %vm108_vm2, %v445_v11 }
 0x189   :  { %786 = vmatmul.msk.bf16.gmra.mxu2 %vm304_vm0, %v650_v10 }
 0x1d4   :  { %v471_v27 = vpop.f32.mrf.mxu0 }
 0x1d5   :  { %v491_v29 = vmul.f32 1.442695, %v471_v27 }
 0x1d7   :  { %841 = vpow2.f32 %v491_v29 }
 0x1dc   :  { %v473_v23 = vpop.f32.mrf.mxu0 }
 0x1dd   :  { %v842_v30 = vpop.eup %841  ;;  %v493_v31 = vmul.f32 1.442695, %v473_v23 }
 0x1de   :  { %v507_v33 = vsel %vm304_vm0, %v842_v30, 0.0 }
 0x1df   :  { %843 = vpow2.f32 %v493_v31  ;;  %508 = vadd.xlane.f32.xlu1 %v507_v33 }
 0x1e4   :  { %v476_v35 = vpop.f32.mrf.mxu0 }
 0x1e5   :  { %v844_v36 = vpop.eup %843  ;;  %v495_v37 = vmul.f32 1.442695, %v476_v35 }
 0x1e6   :  { %v510_v38 = vsel %vm304_vm0, %v844_v36, 0.0 }
 0x1e7   :  { %845 = vpow2.f32 %v495_v37 }
 0x1e9   :  { %v481_v41 = vpop.f32.mrf.mxu1 }
 0x1ea   :  { %v499_v44 = vmul.f32 1.442695, %v481_v41 }
 0x1ec   :  { %v227_v13 = vpop.f32.mrf.mxu2  ;;  %v478_v42 = vpop.f32.mrf.mxu0 }
 0x1ed   :  { %v1167_v14 = vadd.f32 %v824_v12, %v227_v13  ;;  %v846_v39 = vpop.eup %845  ;;  %v497_v43 = vmul.f32 1.442695, %v478_v42 }
 0x1ee   :  { %v513_v40 = vsel %vm304_vm0, %v846_v39, 0.0 }
 0x1ef   :  { %v232_v15 = vmul.f32 %v1167_v14, %v1167_v14  ;;  %514 = vadd.xlane.f32.xlu1 %v513_v40  ;;  %847 = vpow2.f32 %v497_v43 }
 0x1f0   :  { %849 = vpow2.f32 %v499_v44 }
 0x1f1   :  { %v234_v17 = vsel %vm108_vm2, %v232_v15, 0.0  ;;  %v483_v46 = vpop.f32.mrf.mxu1 }
 0x1f2   :  { %235 = vadd.xlane.f32.xlu2 %v234_v17  ;;  %v501_v47 = vmul.f32 1.442695, %v483_v46 }
 0x1f4   :  { %v229_v18 = vpop.f32.mrf.mxu2  ;;  %851 = vpow2.f32 %v501_v47 }
 0x1f5   :  { %v1172_v20 = vadd.f32 %v824_v12, %v229_v18  ;;  %v848_v48 = vpop.eup %847 }
 0x1f6   :  { %v850_v51 = vpop.eup %849  ;;  %v516_v57 = vsel %vm304_vm0, %v848_v48, 0.0 }
 0x1f7   :  { %v233_v22 = vmul.f32 %v1172_v20, %v1172_v20  ;;  %v519_v56 = vsel %vm304_vm0, %v850_v51, 0.0 }
 0x1f8   :  { %520 = vadd.xlane.f32.xlu1 %v519_v56 }
 0x1f9   :  { %v237_v24 = vsel %vm108_vm2, %v233_v22, 0.0  ;;  %v486_v52 = vpop.f32.mrf.mxu1 }
 0x1fa   :  { %238 = vadd.xlane.f32.xlu2 %v237_v24  ;;  %v503_v53 = vmul.f32 1.442695, %v486_v52  ;;  %v852_v60 = vpop.eup %851 }
 0x1fb   :  { %v522_v21 = vsel %vm304_vm0, %v852_v60, 0.0 }
 0x1fc   :  { %v674_v45 = vpop.f32.mrf.mxu2  ;;  %853 = vpow2.f32 %v503_v53 }
 0x1fd   :  { %v684_v58 = vmul.f32 1.442695, %v674_v45 }
 0x1ff   :  { %855 = vpow2.f32 %v684_v58 }
 0x202   :  { %270 = vadd.xlane.f32.xlu2 %v269_v26  ;;  %v854_v61 = vpop.eup %853 }
 0x203   :  { %v525_v62 = vsel %vm304_vm0, %v854_v61, 0.0 }
 0x204   :  { %v676_v34 = vpop.f32.mrf.mxu2  ;;  %526 = vadd.xlane.f32.xlu1 %v525_v62 }
 0x205   :  { %v686_v59 = vmul.f32 1.442695, %v676_v34  ;;  %v856_v0 = vpop.eup %855 }
 0x206   :  { %v692_v3 = vsel %vm108_vm2, %v856_v0, 0.0 }
 0x207   :  { %857 = vpow2.f32 %v686_v59 }
 0x20a   :  { %511 = vadd.xlane.f32.xlu2 %v510_v38 }
 0x20c   :  { %v679_v19 = vpop.f32.mrf.mxu2 }
 0x20d   :  { %v688_v63 = vmul.f32 1.442695, %v679_v19  ;;  %v858_v1 = vpop.eup %857 }
 0x20e   :  { %v695_v2 = vsel %vm108_vm2, %v858_v1, 0.0 }
 0x20f   :  { %859 = vpow2.f32 %v688_v63  ;;  %696 = vadd.xlane.f32.xlu1 %v695_v2 }
 0x210   :  { %861 = vrsqrt.f32 %v272_v7 }
 0x212   :  { %517 = vadd.xlane.f32.xlu2 %v516_v57 }
 0x214   :  { %v681_v59 = vpop.f32.mrf.mxu2 }
 0x215   :  { %v860_v54 = vpop.eup %859  ;;  %v690_v60 = vmul.f32 1.442695, %v681_v59 }
 0x216   :  { %v698_v55 = vsel %vm108_vm2, %v860_v54, 0.0  ;;  %v862_v49 = vpop.eup %861 }
 0x217   :  { %699 = vadd.xlane.f32.xlu0 %v698_v55  ;;  %v275_v50 = vmul.f32 %v862_v49, %v272_v7  ;;  %vm281_vm12 = vweird.f32 %v862_v49 }
 0x218   :  { %vm282_vm4 = vmor %vm280_vm15, %vm281_vm12 }
 0x219   :  { %v276_v11 = vmul.f32 %v862_v49, %v275_v50 }
 0x21a   :  { %523 = vadd.xlane.f32.xlu2 %v522_v21  ;;  %v488_v21 = vpop.f32.mrf.mxu1 }
 0x21b   :  { %v277_v15 = vmul.f32 0.5, %v276_v11  ;;  %v505_v0 = vmul.f32 1.442695, %v488_v21 }
 0x21d   :  { %v278_v26 = vsub.f32 1.5, %v277_v15 }
 0x21f   :  { %v279_v31 = vmul.f32 %v862_v49, %v278_v26 }
 0x221   :  { %v283_v39 = vsel %vm282_vm4, %v862_v49, %v279_v31 }
 0x222   :  { %693 = vadd.xlane.f32.xlu2 %v692_v3  ;;  %v294_v44 = vmul.f32 %v283_v39, %v1096_v28 }
 0x252   :  { %v509_v4 = vpop.xlane.xlu1 %508 }
 0x262   :  { %v515_v7 = vpop.xlane.xlu1 %514 }
 0x265   :  { %v236_v8 = vpop.xlane.xlu2 %235 }
 0x266   :  { %v240_v9 = vmax.f32 %v236_v8, 1e-24 }
 0x268   :  { %863 = vrsqrt.f32 %v240_v9  ;;  %vm248_vm13 = vweird.f32 %v240_v9 }
 0x26d   :  { %v239_v10 = vpop.xlane.xlu2 %238 }
 0x26e   :  { %v864_v5 = vpop.eup %863  ;;  %v241_v6 = vmax.f32 %v239_v10, 1e-24 }
 0x26f   :  { %v243_v12 = vmul.f32 %v864_v5, %v240_v9  ;;  %vm249_vm1 = vweird.f32 %v864_v5  ;;  %v521_v9 = vpop.xlane.xlu1 %520 }
 0x270   :  { %865 = vrsqrt.f32 %v241_v6  ;;  %vm250_vm14 = vmor %vm248_vm13, %vm249_vm1  ;;  %vm258_vm5 = vweird.f32 %v241_v6 }
 0x271   :  { %v244_v13 = vmul.f32 %v864_v5, %v243_v12  ;;  %v776_v12 = vadd.f32 -148.41316, %v509_v4 }
 0x273   :  { %v245_v17 = vmul.f32 0.5, %v244_v13 }
 0x275   :  { %v246_v18 = vsub.f32 1.5, %v245_v17  ;;  %v271_v22 = vpop.xlane.xlu2 %270 }
 0x276   :  { %v866_v24 = vpop.eup %865  ;;  %v273_v25 = vmax.f32 %v271_v22, 1e-24 }
 0x277   :  { %v253_v27 = vmul.f32 %v866_v24, %v241_v6  ;;  %v247_v29 = vmul.f32 %v864_v5, %v246_v18  ;;  %vm259_vm3 = vweird.f32 %v866_v24  ;;  %v527_v50 = vpop.xlane.xlu1 %526  ;;  %v778_v18 = vadd.f32 -148.41316, %v515_v7 }
 0x278   :  { %867 = vrsqrt.f32 %v273_v25  ;;  %vm260_vm6 = vmor %vm258_vm5, %vm259_vm3  ;;  %vm290_vm8 = vweird.f32 %v273_v25 }
 0x279   :  { %v254_v23 = vmul.f32 %v866_v24, %v253_v27  ;;  %v251_v33 = vsel %vm250_vm14, %v864_v5, %v247_v29  ;;  %v780_v29 = vadd.f32 -148.41316, %v521_v9 }
 0x27a   :  { %v262_v40 = vmul.f32 %v251_v33, %v1167_v14 }
 0x27b   :  { %v255_v30 = vmul.f32 0.5, %v254_v23 }
 0x27c   :  { %v343_v48 = vmul.f32 5.0, %v262_v40 }
 0x27d   :  { %v256_v35 = vsub.f32 1.5, %v255_v30  ;;  %v512_v8 = vpop.xlane.xlu2 %511 }
 0x27e   :  { %v868_v36 = vpop.eup %867  ;;  %v777_v15 = vadd.f32 -148.41316, %v512_v8 }
 0x27f   :  { %v285_v37 = vmul.f32 %v868_v36, %v273_v25  ;;  %v257_v38 = vmul.f32 %v866_v24, %v256_v35  ;;  %vm291_vm7 = vweird.f32 %v868_v36 }
 0x280   :  { %vm292_vm9 = vmor %vm290_vm8, %vm291_vm7 }
 0x281   :  { %v286_v41 = vmul.f32 %v868_v36, %v285_v37  ;;  %v261_v42 = vsel %vm260_vm6, %v866_v24, %v257_v38 }
 0x282   :  { %v263_v43 = vmul.f32 %v261_v42, %v1172_v20  ;;  %v697_v5 = vpop.xlane.xlu1 %696 }
 0x283   :  { %v287_v45 = vmul.f32 0.5, %v286_v41  ;;  %v788_v39 = vadd.f32 -148.41316, %v697_v5 }
 0x284   :  { %v339_v46 = vmul.f32 %v294_v44, %v263_v43  ;;  %v344_v47 = vmul.f32 5.0, %v263_v43 }
 0x285   :  { %v288_v51 = vsub.f32 1.5, %v287_v45  ;;  %v518_v49 = vpop.xlane.xlu2 %517 }
 0x286   :  { %v340_v34 = vsel %vm108_vm2, %v339_v46, 0.0  ;;  %v345_v52 = vpack.c.bf16 %v344_v47, %v343_v48  ;;  %v779_v25 = vadd.f32 -148.41316, %v518_v49  ;;  %v782_v46 = vadd.f32 -148.41316, %v527_v50 }
 0x287   :  { %341 = vadd.xlane.f32.xlu2 %v340_v34  ;;  %v289_v53 = vmul.f32 %v868_v36, %v288_v51 }
 0x288   :  { %771 = vmatmul.msk.bf16.vlgmr.msrb.gmra.mxu3 %vm108_vm2, %v345_v52 }
 0x289   :  { %v293_v14 = vsel %vm292_vm9, %v868_v36, %v289_v53 }
 0x28a   :  { %v295_v20 = vmul.f32 %v293_v14, %v1101_v32  ;;  %v700_v44 = vpop.xlane.xlu0 %699 }
 0x28b   :  { %v789_v51 = vadd.f32 -148.41316, %v700_v44 }
 0x28c   :  { %v335_v56 = vmul.f32 %v295_v20, %v262_v40 }
 0x28d   :  { %v524_v10 = vpop.xlane.xlu2 %523 }
 0x28e   :  { %v336_v28 = vsel %vm108_vm2, %v335_v56, 0.0  ;;  %v781_v38 = vadd.f32 -148.41316, %v524_v10 }
 0x28f   :  { %337 = vadd.xlane.f32.xlu1 %v336_v28 }
 0x295   :  { %v694_v6 = vpop.xlane.xlu2 %693 }
 0x296   :  { %v787_v43 = vadd.f32 -148.41316, %v694_v6 }
 0x2fa   :  { %v342_v22 = vpop.xlane.xlu2 %341 }
 0x2fb   :  { %v1201_v24 = vmul.f32 5.0, %v342_v22 }
 0x2fd   :  { %v401_v23 = vmul.f32 1.442695, %v1201_v24 }
 0x302   :  { %v338_v11 = vpop.xlane.xlu1 %337 }
 0x303   :  { %v373_v13 = vmul.f32 5.0, %v338_v11 }
 0x305   :  { %v374_v17 = vmul.f32 1.442695, %v373_v13 }
 0x30b   :  { %v358_v57 = vpop.f32.mrf.mxu3 }
 0x30c   :  { %v363_v58 = vmul.f32 1.442695, %v358_v57 }
 0x30e   :  { %869 = vpow2.f32 %v363_v58 }
 0x30f   :  { %871 = vpow2.f32 %v690_v60 }
 0x313   :  { %v360_v61 = vpop.f32.mrf.mxu3 }
 0x314   :  { %v870_v19 = vpop.eup %869  ;;  %v365_v62 = vmul.f32 1.442695, %v360_v61 }
 0x315   :  { %v367_v63 = vsel %vm304_vm0, %v870_v19, 0.0  ;;  %v872_v32 = vpop.eup %871 }
 0x316   :  { %873 = vpow2.f32 %v365_v62  ;;  %368 = vadd.xlane.f32.xlu1 %v367_v63  ;;  %v701_v3 = vsel %vm108_vm2, %v872_v32, 0.0 }
 0x317   :  { %875 = vpow2.f32 %v505_v0 }
 0x318   :  { %877 = vlog2.f32 %v776_v12 }
 0x319   :  { %879 = vlog2.f32 %v777_v15 }
 0x31a   :  { %881 = vpow2.f32 %v374_v17 }
 0x31b   :  { %883 = vlog2.f32 %v778_v18 }
 0x31c   :  { %v874_v1 = vpop.eup %873  ;;  %885 = vlog2.f32 %v779_v25 }
 0x31d   :  { %v370_v2 = vsel %vm304_vm0, %v874_v1, 0.0  ;;  %v876_v54 = vpop.eup %875  ;;  %887 = vlog2.f32 %v780_v29 }
 0x31e   :  { %371 = vadd.xlane.f32.xlu2 %v370_v2  ;;  %702 = vadd.xlane.f32.xlu1 %v701_v3  ;;  %v528_v55 = vsel %vm304_vm0, %v876_v54, 0.0  ;;  %v878_v26 = vpop.eup %877  ;;  %889 = vpow2.f32 %v401_v23  ;;  %vm380_vm0 = vcmask 7168  }
 0x31f   :  { %v880_v27 = vpop.eup %879  ;;  %v540_v31 = vmul.f32 0.6931472, %v878_v26 }
 0x320   :  { %v882_v30 = vpop.eup %881  ;;  %v542_v33 = vmul.f32 0.6931472, %v880_v27 }
 0x321   :  { %v884_v36 = vpop.eup %883  ;;  %v555_v40 = vsel %vm380_vm0, %v540_v31, 0.0 }
 0x322   :  { %v544_v41 = vmul.f32 0.6931472, %v884_v36  ;;  %v556_v42 = vsel %vm380_vm0, %v542_v33, 0.0  ;;  %v886_v45 = vpop.eup %885 }
 0x323   :  { %v888_v47 = vpop.eup %887  ;;  %v557_v48 = vadd.f32 %v556_v42, %v555_v40  ;;  %v546_v53 = vmul.f32 0.6931472, %v886_v45 }
 0x324   :  { %v890_v34 = vpop.eup %889  ;;  %v558_v52 = vsel %vm380_vm0, %v544_v41, 0.0  ;;  %v548_v61 = vmul.f32 0.6931472, %v888_v47  ;;  %v971_v41 = vmov 32.0  }
 0x325   :  { %v559_v59 = vadd.f32 %v558_v52, %v557_v48  ;;  %v560_v19 = vsel %vm380_vm0, %v546_v53, 0.0 }
 0x326   :  { %529 = vadd.xlane.f32.xlu2 %v528_v55  ;;  %v562_v2 = vsel %vm380_vm0, %v548_v61, 0.0 }
 0x327   :  { %v561_v32 = vadd.f32 %v560_v19, %v559_v59 }
 0x329   :  { %v563_v50 = vadd.f32 %v562_v2, %v561_v32 }
 0x389   :  { %v369_v35 = vpop.xlane.xlu1 %368 }
 0x38a   :  { %v376_v37 = vadd.f32 %v882_v30, %v369_v35 }
 0x38c   :  { %891 = vlog2.f32 %v376_v37 }
 0x38d   :  { %893 = vlog2.f32 %v781_v38 }
 0x38e   :  { %895 = vlog2.f32 %v788_v39  ;;  %v970_v39 = vmov 64.0  }
 0x38f   :  { %897 = vlog2.f32 %v787_v43 }
 0x390   :  { %899 = vlog2.f32 %v782_v46 }
 0x391   :  { %v703_v14 = vpop.xlane.xlu1 %702  ;;  %v372_v20 = vpop.xlane.xlu2 %371  ;;  %901 = vlog2.f32 %v789_v51 }
 0x392   :  { %v892_v56 = vpop.eup %891  ;;  %v403_v28 = vadd.f32 %v890_v34, %v372_v20  ;;  %v790_v58 = vadd.f32 -148.41316, %v703_v14 }
 0x393   :  { %v378_v57 = vmul.f32 0.6931472, %v892_v56  ;;  %v894_v60 = vpop.eup %893 }
 0x394   :  { %903 = vlog2.f32 %v403_v28  ;;  %v896_v21 = vpop.eup %895  ;;  %v550_v3 = vmul.f32 0.6931472, %v894_v60 }
 0x395   :  { %v379_v62 = vsub.f32 %v378_v57, %v373_v13  ;;  %v898_v63 = vpop.eup %897  ;;  %905 = vlog2.f32 %v790_v58  ;;  %v711_v4 = vmul.f32 0.6931472, %v896_v21 }
 0x396   :  { %v900_v1 = vpop.eup %899  ;;  %v709_v7 = vmul.f32 0.6931472, %v898_v63  ;;  %v564_v6 = vsel %vm380_vm0, %v550_v3, 0.0 }
 0x397   :  { %v381_v0 = vsel %vm380_vm0, %v379_v62, 0.0  ;;  %v902_v55 = vpop.eup %901  ;;  %v552_v5 = vmul.f32 0.6931472, %v900_v1  ;;  %v717_v11 = vsel %vm380_vm0, %v711_v4, 0.0  ;;  %v565_v22 = vadd.f32 %v564_v6, %v563_v50 }
 0x398   :  { %382 = vadd.xlane.f32.xlu2 %v381_v0  ;;  %v716_v12 = vsel %vm380_vm0, %v709_v7, 0.0  ;;  %v713_v13 = vmul.f32 0.6931472, %v902_v55  ;;  %v742_v50 = vlaneseq }
 0x399   :  { %v530_v54 = vpop.xlane.xlu2 %529  ;;  %v718_v25 = vadd.f32 %v717_v11, %v716_v12  ;;  %v566_v26 = vsel %vm380_vm0, %v552_v5, 0.0  ;;  %v972_v5 = vmov 0.0  }
 0x39a   :  { %v783_v8 = vadd.f32 -148.41316, %v530_v54  ;;  %v904_v9 = vpop.eup %903  ;;  %v719_v29 = vsel %vm380_vm0, %v713_v13, 0.0  ;;  %v567_v31 = vadd.f32 %v566_v26, %v565_v22 }
 0x39b   :  { %v405_v49 = vmul.f32 0.6931472, %v904_v9  ;;  %v906_v10 = vpop.eup %905  ;;  %v720_v33 = vadd.f32 %v719_v29, %v718_v25 }
 0x39c   :  { %907 = vlog2.f32 %v783_v8  ;;  %v715_v17 = vmul.f32 0.6931472, %v906_v10  ;;  %v743_v10 = vand.u32 127, %v742_v50 }
 0x39d   :  { %v406_v15 = vsub.f32 %v405_v49, %v1201_v24  ;;  %909 = vrcp.f32 %v970_v39 }
 0x39e   :  { %v721_v30 = vsel %vm380_vm0, %v715_v17, 0.0  ;;  %911 = vrcp.f32 %v971_v41  ;;  %vm744_vm11 = vcmp.eq.s32.totalorder %v743_v10, 0  ;;  %vm749_vm1 = vcmp.eq.s32.totalorder %v743_v10, 1 }
 0x39f   :  { %v407_v18 = vsel %vm380_vm0, %v406_v15, 0.0  ;;  %v722_v24 = vadd.f32 %v721_v30, %v720_v33  ;;  %vm755_vm12 = vcmp.eq.s32.totalorder %v743_v10, 2  ;;  %v792_v6 = vsel %vm744_vm11, 1.0, %v972_v5 }
 0x3a0   :  { %408 = vadd.xlane.f32.xlu1 %v407_v18  ;;  %v793_v12 = vsel %vm749_vm1, 1.0, %v972_v5  ;;  %v794_v15 = vsel %vm755_vm12, 1.0, %v972_v5 }
 0x3a2   :  { %v908_v27 = vpop.eup %907 }
 0x3a3   :  { %v554_v23 = vmul.f32 0.6931472, %v908_v27  ;;  %v910_v44 = vpop.eup %909 }
 0x3a4   :  { %v912_v47 = vpop.eup %911  ;;  %v580_v34 = vmul.f32 64.0, %v910_v44  ;;  %vm584_vm2 = vweird.f32 %v910_v44 }
 0x3a5   :  { %v568_v35 = vsel %vm380_vm0, %v554_v23, 0.0  ;;  %v733_v53 = vmul.f32 32.0, %v912_v47  ;;  %vm737_vm10 = vweird.f32 %v912_v47 }
 0x3a6   :  { %v569_v36 = vadd.f32 %v568_v35, %v567_v31  ;;  %v581_v20 = vsub.f32 1.0, %v580_v34 }
 0x3a7   :  { %v734_v59 = vsub.f32 1.0, %v733_v53 }
 0x3a8   :  { %570 = vadd.xlane.f32.xlu2 %v569_v36  ;;  %723 = vadd.xlane.f32.xlu1 %v722_v24  ;;  %v582_v62 = vmul.f32 %v910_v44, %v581_v20 }
 0x3a9   :  { %v735_v32 = vmul.f32 %v912_v47, %v734_v59 }
 0x3aa   :  { %v583_v3 = vadd.f32 %v910_v44, %v582_v62 }
 0x3ab   :  { %v736_v55 = vadd.f32 %v912_v47, %v735_v32 }
 0x3ac   :  { %v585_v8 = vsel %vm584_vm2, %v910_v44, %v583_v3 }
 0x3ad   :  { %v738_v49 = vsel %vm737_vm10, %v912_v47, %v736_v55 }
 0x40b   :  { %v383_v37 = vpop.xlane.xlu2 %382 }
 0x40c   :  { %v384_v38 = vrot.slane %v383_v37, 4 }
 0x40e   :  { %v385_v40 = vadd.f32 %v384_v38, %v383_v37 }
 0x410   :  { %v386_v42 = vrot.slane %v385_v40, 2 }
 0x412   :  { %v387_v43 = vadd.f32 %v386_v42, %v385_v40 }
 0x413   :  { %v409_v45 = vpop.xlane.xlu1 %408 }
 0x414   :  { %v388_v46 = vrot.slane %v387_v43, 1  ;;  %v410_v48 = vrot.slane %v409_v45, 4 }
 0x416   :  { %v389_v51 = vadd.f32 %v388_v46, %v387_v43  ;;  %v411_v52 = vadd.f32 %v410_v48, %v409_v45 }
 0x418   :  { %797 = vpush %v389_v51  ;;  %v412_v14 = vrot.slane %v411_v52, 2 }
 0x419   :  { %799 = vpush %v1124_v16 }
 0x41a   :  { %v413_v28 = vadd.f32 %v412_v14, %v411_v52 }
 0x41b   :  { %v571_v56 = vpop.xlane.xlu2 %570  ;;  %v724_v57 = vpop.xlane.xlu1 %723 }
 0x41c   :  { %v572_v58 = vrot.slane %v571_v56, 4  ;;  %v725_v60 = vrot.slane %v724_v57, 4  ;;  %v414_v61 = vrot.slane %v413_v28, 1 }
 0x41e   :  { %v573_v19 = vadd.f32 %v572_v58, %v571_v56  ;;  %v726_v21 = vadd.f32 %v725_v60, %v724_v57  ;;  %v415_v63 = vadd.f32 %v414_v61, %v413_v28 }
 0x420   :  { %v574_v0 = vrot.slane %v573_v19, 2  ;;  %v727_v1 = vrot.slane %v726_v21, 2  ;;  %801 = vpush %v415_v63 }
 0x422   :  { %v575_v2 = vadd.f32 %v574_v0, %v573_v19  ;;  %v728_v54 = vadd.f32 %v727_v1, %v726_v21 }
 0x424   :  { %v576_v16 = vrot.slane %v575_v2, 1  ;;  %v729_v4 = vrot.slane %v728_v54, 1 }
 0x426   :  { %v577_v7 = vadd.f32 %v576_v16, %v575_v2  ;;  %v730_v9 = vadd.f32 %v729_v4, %v728_v54 }
 0x428   :  { %803 = vpush %v577_v7 }
 0x429   :  { %805 = vpush %v585_v8 }
 0x42a   :  { %807 = vpush %v730_v9 }
 0x42b   :  { %809 = vpush %v738_v49 }
 0x449   :  { %s798_s9 = spop %797 }
 0x44a   :  { %s800_s12 = spop %799 }
 0x44b   :  { %s399_s8 = smul.f32 %s800_s12, %s798_s9 }
 0x451   :  { %s802_s13 = spop %801 }
 0x452   :  { %s425_s14 = smul.f32 %s802_s13, %s800_s12 }
 0x454   :  { %s426_s15 = sadd.f32 %s425_s14, %s399_s8 }
 0x456   :  { %s427_s16 = smul.f32 0.5, %s426_s15 }
 0x458   :  { %v747_v11 = vstv %s427_s16 }
 0x459   :  { %s804_s17 = spop %803  ;;  %v748_v17 = vmul.f32 %v792_v6, %v747_v11 }
 0x45a   :  { %s806_s0 = spop %805 }
 0x45b   :  { %s587_s2 = smul.f32 %s806_s0, %s804_s17  ;;  %s808_s18 = spop %807 }
 0x45c   :  { %s810_s19 = spop %809 }
 0x45d   :  { %s784_s20 = sadd.f32 -5.0, %s587_s2  ;;  %s740_s21 = smul.f32 %s810_s19, %s808_s18 }
 0x45f   :  { %v752_v13 = vstv %s784_s20  ;;  %s791_s22 = sadd.f32 -5.0, %s740_s21 }
 0x460   :  { %v753_v18 = vmul.f32 %v793_v12, %v752_v13 }
 0x461   :  { %v758_v22 = vstv %s791_s22 }
 0x462   :  { %v754_v25 = vadd.f32 %v753_v18, %v748_v17  ;;  %v759_v26 = vmul.f32 %v794_v15, %v758_v22 }
 0x464   :  { %v760_v27 = vadd.f32 %v759_v26, %v754_v25 }
 0x466   :  { %761 = vst [vmem:[%s1234_s11] sm:$0x1] %v760_v27 }
 0x467   :  { %766 = vsyncpa [#allocation3], 1 }
 0x468   :  { %767 = vsyncpa [#allocation5], 1 }

</bundles_post_ra>
